<compile_context>
chip_gen: v6e
topology: v6e:2x2x1
jax: 0.10.0
libtpu: 0.0.40
codegen_flags: <defaults>
</compile_context>

<pallas_src>
from functools import partial

import jax
import jax.numpy as jnp
from jax.experimental import pallas as pl
from jax.experimental.pallas import tpu as pltpu

# Module constants from the reference file.
INPUT_SIZE = 784
HIDDEN_SIZE = 500
NUM_CLASSES = 10


def _round_up(n, m):
    return (n + m - 1) // m * m


def _toy_mlp_kernel(x_ref, w1_ref, b1_ref, w2_ref, b2_ref, o_ref):
    """Full-batch 2-stage toy model: relu(x@W1+b1) @ W2 + b2 (f32 accum)."""
    # In-kernel bf16 cast of activations (hides under the W1 weight DMA).
    x = x_ref[...].astype(jnp.bfloat16)
    # Stage 1 (TM0): Linear + ReLU.  bf16 operands, f32 MXU accumulation.
    h = jnp.dot(x, w1_ref[...], preferred_element_type=jnp.float32)
    h = jnp.maximum(h + b1_ref[...], 0.0)
    # Stage 2 (TM1): Linear.  Downcast activations to bf16 for the MXU.
    z = jnp.dot(h.astype(jnp.bfloat16), w2_ref[...],
                preferred_element_type=jnp.float32)
    o_ref[...] = z + b2_ref[...]


def prepare_params(w1, b1, w2, b2):
    """One-time (init-time) parameter prep: pad to lane multiples + bf16 cast.

    Hoisted out of the forward path so no per-call pad/convert HBM traffic.
    Pads are exactly zero, so padded hidden columns give ReLU(0+0)=0 and meet
    zero rows of W2; padded class columns are sliced off after the kernel.
    """
    in_dim, hidden = w1.shape
    n_classes = w2.shape[1]
    hid_p = _round_up(hidden, 128)     # 500 -> 512
    cls_p = _round_up(n_classes, 128)  # 10  -> 128 (lane-dense output store)

    w1_p = jnp.pad(w1, ((0, 0), (0, hid_p - hidden))).astype(jnp.bfloat16)
    b1_p = jnp.pad(b1, (0, hid_p - hidden)).reshape(1, hid_p).astype(jnp.float32)
    w2_p = jnp.pad(w2, ((0, hid_p - hidden), (0, cls_p - n_classes))).astype(jnp.bfloat16)
    b2_p = jnp.pad(b2, (0, cls_p - n_classes)).reshape(1, cls_p).astype(jnp.float32)
    return w1_p, b1_p, w2_p, b2_p


@partial(jax.jit, static_argnames=("num_classes", "split_size"))
def dist_toy_model_forward(xs, w1_p, b1_p, w2_p, b2_p, *,
                           num_classes=NUM_CLASSES, split_size=None):
    """Pallas equivalent of DistToyModel.forward.

    `split_size` (the RPC micro-batch size) is accepted for API fidelity but
    ignored: micro-batching over a serial TensorCore is pure overhead, so the
    full batch is processed in one kernel invocation.  Output equals the
    concatenation of the per-micro-batch results.
    """
    del split_size  # pipelined-RPC micro-batching collapsed into one step

    B, in_dim = xs.shape
    hid_p = w1_p.shape[1]
    cls_p = w2_p.shape[1]

    flops = 2 * B * (in_dim * hid_p + hid_p * cls_p)
    bytes_accessed = (xs.size * 4 + w1_p.size * 2 + b1_p.size * 4
                      + w2_p.size * 2 + b2_p.size * 4 + B * cls_p * 4)

    vmem = pl.BlockSpec(memory_space=pltpu.MemorySpace.VMEM)
    out_p = pl.pallas_call(
        _toy_mlp_kernel,
        out_shape=jax.ShapeDtypeStruct((B, cls_p), jnp.float32),
        in_specs=[vmem, vmem, vmem, vmem, vmem],
        out_specs=vmem,
        cost_estimate=pl.CostEstimate(flops=flops, transcendentals=0,
                                      bytes_accessed=bytes_accessed),
    )(xs, w1_p, b1_p, w2_p, b2_p)

    # TODO(synk): for large batches on v7x, add a "parallel" batch grid axis
    # (~256-row blocks) so both TensorCores share the work.

    # Strip class-lane padding back to num_classes.
    return out_p[:, :num_classes].astype(xs.dtype)


def _reference_f32(xs, w1, b1, w2, b2):
    h = jnp.maximum(xs @ w1 + b1, 0.0)
    return h @ w2 + b2


def _reference_bf16_mirror(xs, w1, b1, w2, b2):
    """Mirrors the kernel's bf16-operand / f32-accumulation policy."""
    h = jnp.dot(xs.astype(jnp.bfloat16), w1.astype(jnp.bfloat16),
                preferred_element_type=jnp.float32)
    h = jnp.maximum(h + b1.astype(jnp.float32), 0.0)
    z = jnp.dot(h.astype(jnp.bfloat16), w2.astype(jnp.bfloat16),
                preferred_element_type=jnp.float32)
    return z + b2.astype(jnp.float32)


if __name__ == "__main__":
    key = jax.random.PRNGKey(0)
    k_x, k_w1, k_b1, k_w2, k_b2 = jax.random.split(key, 5)

    batch = 8
    split_size = 2  # micro-batch size used by DistToyModel.forward (collapsed)

    xs = jax.random.normal(k_x, (batch, INPUT_SIZE), dtype=jnp.float32)

    # Deterministic parameter init (nn.Linear-style uniform fan-in bound).
    bound1 = 1.0 / (INPUT_SIZE ** 0.5)
    w1 = jax.random.uniform(k_w1, (INPUT_SIZE, HIDDEN_SIZE), jnp.float32,
                            -bound1, bound1)
    b1 = jax.random.uniform(k_b1, (HIDDEN_SIZE,), jnp.float32, -bound1, bound1)
    bound2 = 1.0 / (HIDDEN_SIZE ** 0.5)
    w2 = jax.random.uniform(k_w2, (HIDDEN_SIZE, NUM_CLASSES), jnp.float32,
                            -bound2, bound2)
    b2 = jax.random.uniform(k_b2, (NUM_CLASSES,), jnp.float32, -bound2, bound2)

    # One-time parameter prep (hoisted out of the per-call forward path).
    w1_p, b1_p, w2_p, b2_p = prepare_params(w1, b1, w2, b2)
    (w1_p, b1_p, w2_p, b2_p) = jax.block_until_ready((w1_p, b1_p, w2_p, b2_p))

    out = dist_toy_model_forward(xs, w1_p, b1_p, w2_p, b2_p,
                                 num_classes=NUM_CLASSES, split_size=split_size)
    out = jax.block_until_ready(out)
    assert out.shape == (batch, NUM_CLASSES)

    # Strict check against a reference that mirrors the bf16 operand policy.
    ref_bf16 = _reference_bf16_mirror(xs, w1, b1, w2, b2)
    assert jnp.allclose(out, ref_bf16, atol=5e-3, rtol=5e-3), \
        "mismatch vs bf16-mirror reference"

    # Sanity check against the pure-f32 reference (loose bf16 tolerance).
    ref_f32 = _reference_f32(xs, w1, b1, w2, b2)
    assert jnp.allclose(out, ref_f32, atol=5e-2, rtol=5e-2), \
        "mismatch vs f32 reference"

    # TODO(synk): RPC/distributed-autograd plumbing (RRef, rpc.remote,
    # DistributedOptimizer, parameter_rrefs) has no Pallas equivalent; only the
    # forward compute is mapped.
    print("KERNEL_OK")
</pallas_src>

<mosaic_0001>
module attributes {stable_mosaic.version = 11 : i64} {
  func.func @_toy_mlp_kernel(%arg0: memref<8x784xf32, #tpu.memory_space<vmem>>, %arg1: memref<784x512xbf16, #tpu.memory_space<vmem>>, %arg2: memref<1x512xf32, #tpu.memory_space<vmem>>, %arg3: memref<512x128xbf16, #tpu.memory_space<vmem>>, %arg4: memref<1x128xf32, #tpu.memory_space<vmem>>, %arg5: memref<8x128xf32, #tpu.memory_space<vmem>>) attributes {dimension_semantics = [], scalar_prefetch = 0 : i64, scratch_operands = 0 : i64, tpu.core_type = #tpu.core_type<tc>} {
    %c0 = arith.constant 0 : index
    %c0_0 = arith.constant 0 : index
    %0 = vector.load %arg0[%c0, %c0_0] : memref<8x784xf32, #tpu.memory_space<vmem>>, vector<8x784xf32>
    %1 = arith.truncf %0 : vector<8x784xf32> to vector<8x784xbf16>
    %c0_1 = arith.constant 0 : index
    %c0_2 = arith.constant 0 : index
    %2 = vector.load %arg1[%c0_1, %c0_2] : memref<784x512xbf16, #tpu.memory_space<vmem>>, vector<784x512xbf16>
    %cst = arith.constant dense<0.000000e+00> : vector<8x512xf32>
    %3 = tpu.matmul %1, %2, %cst {dimension_numbers = #tpu.dot_dimension_numbers<[1], [0], [0], [1], [0, 0, 1, 1], [], []>} : vector<8x784xbf16>, vector<784x512xbf16>, vector<8x512xf32> -> vector<8x512xf32>
    %c0_3 = arith.constant 0 : index
    %c0_4 = arith.constant 0 : index
    %4 = vector.load %arg2[%c0_3, %c0_4] : memref<1x512xf32, #tpu.memory_space<vmem>>, vector<1x512xf32>
    %5 = vector.broadcast %4 : vector<1x512xf32> to vector<8x512xf32>
    %6 = arith.addf %3, %5 : vector<8x512xf32>
    %cst_5 = arith.constant 0.000000e+00 : f32
    %7 = vector.broadcast %cst_5 : f32 to vector<8x512xf32>
    %8 = arith.maximumf %6, %7 : vector<8x512xf32>
    %9 = arith.truncf %8 : vector<8x512xf32> to vector<8x512xbf16>
    %c0_6 = arith.constant 0 : index
    %c0_7 = arith.constant 0 : index
    %10 = vector.load %arg3[%c0_6, %c0_7] : memref<512x128xbf16, #tpu.memory_space<vmem>>, vector<512x128xbf16>
    %cst_8 = arith.constant dense<0.000000e+00> : vector<8x128xf32>
    %11 = tpu.matmul %9, %10, %cst_8 {dimension_numbers = #tpu.dot_dimension_numbers<[1], [0], [0], [1], [0, 0, 1, 1], [], []>} : vector<8x512xbf16>, vector<512x128xbf16>, vector<8x128xf32> -> vector<8x128xf32>
    %c0_9 = arith.constant 0 : index
    %c0_10 = arith.constant 0 : index
    %12 = vector.load %arg4[%c0_9, %c0_10] : memref<1x128xf32, #tpu.memory_space<vmem>>, vector<1x128xf32>
    %13 = vector.broadcast %12 : vector<1x128xf32> to vector<8x128xf32>
    %14 = arith.addf %11, %13 : vector<8x128xf32>
    %c0_11 = arith.constant 0 : index
    %c0_12 = arith.constant 0 : index
    %15 = vector.load %arg5[%c0_11, %c0_12] : memref<8x128xf32, #tpu.memory_space<vmem>>, vector<8x128xf32>
    tpu.vector_store %arg5[%c0_11, %c0_12], %14 {strides = array<i32>} : memref<8x128xf32, #tpu.memory_space<vmem>>, vector<8x128xf32>,
    return
  }
}

</mosaic_0001>

<bundles_post_ra>
// kernel: dist_toy_model_forward.1
= control target key start
LH: loop header
LB: loop body
LE: loop exit
PB: predicated region body
PF: predicated region fallthrough
CT: control target
= control target key end

     0   :  { %10 = vsyncpa [#allocation3], 0  ;;  %s2795_s0 = inlined_call_operand.hbm [shape: f32[8,784], index: 0, kind: input, shape index: {}]   ;;  %s2796_s1 = inlined_call_operand.hbm [shape: bf16[784,512], index: 1, kind: input, shape index: {}]   ;;  %s2797_s2 = inlined_call_operand.hbm [shape: f32[1,512], index: 2, kind: input, shape index: {}]   ;;  %s2798_s3 = inlined_call_operand.hbm [shape: bf16[512,128], index: 3, kind: input, shape index: {}]   ;;  %s2799_s4 = inlined_call_operand.vmem [shape: f32[1,128], index: 4, kind: input, shape index: {}]   ;;  %s2800_s5 = inlined_call_operand.hbm [shape: f32[8,128], index: 5, kind: output, shape index: {}]  }
   0x1   :  { %11 = vsyncpa [#allocation6], 0 }
   0x2   :  { %12 = vsyncpa [#allocation9], 0 }
   0x3   :  { %13 = vsyncpa [#allocation4], 0  ;;  %s2705_s18 = smov [#allocation5]  }
   0x4   :  { %s29_s19 = sshll.u32 %s2705_s18, 4  ;;  %s30_s19 = int_to_ptr.vmem [resolvable:$true] %s29_s19 }
   0x5   :  { %s2605_s20 = scalar_lea.vmem %s30_s19, 25088  ;;  %p2610_p1 = scmp.lt.s32.totalorder %s30_s19, %s30_s19 }
   0x6   :  { %p2606_p0 = scmp.ne.s32.totalorder %s30_s19, %s2605_s20  ;;  %p2611_p2 = scmp.lt.s32.totalorder %s2605_s20, %s2605_s20 }
   0x8   :  { %p2612_p3 = por %p2611_p2, %p2610_p1 }
   0xa   :  { %p2613_p4 = pnand %p2612_p3, %p2606_p0 }
   0xc   :  { %2616 = shalt.err (!%p2613_p4)
}
   0xd   :  { %s2706_s21 = smov 256   ;;  %s2707_s22 = smov 16  }
   0xe   :  { %35 = dma.hbm_to_vmem [thread:$0]  %s2796_s1, 25088, %s30_s19, [#allocation6], %s2706_s21, %s2706_s21, %s2707_s22  }
   0xf   :  { %s2708_s25 = smov [#allocation2]   ;;  %s2709_s27 = smov [#allocation7]  }
  0x10   :  { %s20_s26 = sshll.u32 %s2708_s25, 4  ;;  %s42_s28 = sshll.u32 %s2709_s27, 4  ;;  %s21_s26 = int_to_ptr.vmem [resolvable:$true] %s20_s26  ;;  %s43_s28 = int_to_ptr.vmem [resolvable:$true] %s42_s28 }
  0x11   :  { %s2625_s29 = scalar_lea.vmem %s21_s26, 896  ;;  %p2630_p6 = scmp.lt.s32.totalorder %s21_s26, %s21_s26 }
  0x12   :  { %p2626_p5 = scmp.ne.s32.totalorder %s21_s26, %s2625_s29  ;;  %p2631_p7 = scmp.lt.s32.totalorder %s2625_s29, %s2625_s29 }
  0x14   :  { %p2632_p8 = por %p2631_p7, %p2630_p6 }
  0x16   :  { %p2633_p9 = pnand %p2632_p8, %p2626_p5 }
  0x18   :  { %2636 = shalt.err (!%p2633_p9)
}
  0x19   :  { %23 = dma.hbm_to_vmem [thread:$0]  %s2795_s0, 896, %s21_s26, [#allocation3]  }
  0x1a   :  { %s2645_s7 = scalar_lea.vmem %s43_s28, 64  ;;  %p2650_p11 = scmp.lt.s32.totalorder %s43_s28, %s43_s28 }
  0x1b   :  { %p2646_p10 = scmp.ne.s32.totalorder %s43_s28, %s2645_s7  ;;  %p2651_p12 = scmp.lt.s32.totalorder %s2645_s7, %s2645_s7 }
  0x1d   :  { %p2652_p13 = por %p2651_p12, %p2650_p11 }
  0x1f   :  { %p2653_p0 = pnand %p2652_p13, %p2646_p10 }
  0x21   :  { %2656 = shalt.err (!%p2653_p0)
}
  0x22   :  { %45 = dma.hbm_to_vmem [thread:$0]  %s2797_s2, 64, %s43_s28, [#allocation6]  }
  0x23   :  { %s2710_s9 = smov [#allocation8]  }
  0x24   :  { %s51_s10 = sshll.u32 %s2710_s9, 4  ;;  %s52_s10 = int_to_ptr.vmem [resolvable:$true] %s51_s10 }
  0x25   :  { %s2665_s11 = scalar_lea.vmem %s52_s10, 4096  ;;  %p2670_p2 = scmp.lt.s32.totalorder %s52_s10, %s52_s10 }
  0x26   :  { %p2666_p1 = scmp.ne.s32.totalorder %s52_s10, %s2665_s11  ;;  %p2671_p3 = scmp.lt.s32.totalorder %s2665_s11, %s2665_s11 }
  0x28   :  { %p2672_p4 = por %p2671_p3, %p2670_p2 }
  0x2a   :  { %p2673_p5 = pnand %p2672_p4, %p2666_p1 }
  0x2c   :  { %2676 = shalt.err (!%p2673_p5)
}
  0x2d   :  { %s2711_s0 = smov 64   ;;  %s2712_s12 = smov 4  }
  0x2e   :  { %57 = dma.hbm_to_vmem [thread:$0]  %s2798_s3, 4096, %s52_s10, [#allocation9], %s2711_s0, %s2711_s0, %s2712_s12  }
  0x2f   :  { %2697 = dma.done.wait [#allocation3], 896  }
  0x30   :  { %2698 = vsyncadd [#allocation3], 4294966400 }
  0x31   :  { %2699 = dma.done.wait [#allocation6], 25152  }
  0x32   :  { %2700 = vsyncadd [#allocation6], 4294942144 }
  0x33   :  { %2701 = dma.done.wait [#allocation9], 4096  }
  0x34   :  { %2702 = vsyncadd [#allocation9], 4294963200  ;;  %v2271_v0 = vld [vmem:[#allocation5 + $0xe4] ss:$16 sps:$4 sm:$0xff]   ;;  %v2275_v2 = vld [vmem:[#allocation5 + $0xe0] ss:$16 sps:$4 sm:$0xff]  }
  0x35   :  { %v2273_v1 = vld [vmem:[#allocation5 + $0x2e4] ss:$16 sps:$4 sm:$0xff]   ;;  %1289 = vmatprep.subr.bf16.mxu0 %v2271_v0  ;;  %v2276_v3 = vld [vmem:[#allocation5 + $0x2e0] ss:$16 sps:$4 sm:$0xff]   ;;  %vm1285_vm0 = vcmask 130048   ;;  %s2714_s15 = smov [#allocation10]  }
  0x36   :  { %1330 = vmatprep.subr.bf16.mxu1 %v2273_v1  ;;  %v2277_v4 = vld [vmem:[#allocation5 + $0xc4] ss:$16 sps:$4 sm:$0xff]   ;;  %1290 = vmatpush1.bf16.msra.mxu0 %v2275_v2  ;;  %v2281_v6 = vld [vmem:[#allocation5 + $0xc0] ss:$16 sps:$4 sm:$0xff]   ;;  %s1975_s16 = sshll.u32 %s2714_s15, 4  ;;  %s1976_s16 = int_to_ptr.vmem [resolvable:$true] %s1975_s16 }
  0x37   :  { %1331 = vmatpush1.bf16.msra.mxu1 %v2276_v3  ;;  %v2279_v5 = vld [vmem:[#allocation5 + $0x2c4] ss:$16 sps:$4 sm:$0xff]   ;;  %1291 = vmatprep.subr.bf16.mxu0 %v2277_v4  ;;  %v2282_v7 = vld [vmem:[#allocation5 + $0x2c0] ss:$16 sps:$4 sm:$0xff]   ;;  %v73_v4 = vld [vmem:[#allocation2] sm:$0xff]  ;;  %s2677_s17 = scalar_lea.vmem %s1976_s16, 128  ;;  %p2682_p7 = scmp.lt.s32.totalorder %s1976_s16, %s1976_s16 }
  0x38   :  { %1332 = vmatprep.subr.bf16.mxu1 %v2279_v5  ;;  %v2283_v8 = vld [vmem:[#allocation5 + $0xa4] ss:$16 sps:$4 sm:$0xff]   ;;  %v2287_v10 = vld [vmem:[#allocation5 + $0xa0] ss:$16 sps:$4 sm:$0xff]   ;;  %v75_v5 = vld [vmem:[#allocation2 + $0x10] sm:$0xff]  ;;  %p2678_p6 = scmp.ne.s32.totalorder %s1976_s16, %s2677_s17  ;;  %p2683_p8 = scmp.lt.s32.totalorder %s2677_s17, %s2677_s17 }
  0x39   :  { %v2285_v9 = vld [vmem:[#allocation5 + $0x2a4] ss:$16 sps:$4 sm:$0xff]   ;;  %v2288_v11 = vld [vmem:[#allocation5 + $0x2a0] ss:$16 sps:$4 sm:$0xff]  }
  0x3a   :  { %1292 = vmatpush1.bf16.msra.mxu0 %v2281_v6  ;;  %v2289_v12 = vld [vmem:[#allocation5 + $0x84] ss:$16 sps:$4 sm:$0xff]   ;;  %v2293_v14 = vld [vmem:[#allocation5 + $0x80] ss:$16 sps:$4 sm:$0xff]   ;;  %p2684_p9 = por %p2683_p8, %p2682_p7 }
  0x3b   :  { %1333 = vmatpush1.bf16.msra.mxu1 %v2282_v7  ;;  %1293 = vmatprep.subr.bf16.mxu0 %v2283_v8  ;;  %v2291_v13 = vld [vmem:[#allocation5 + $0x284] ss:$16 sps:$4 sm:$0xff]   ;;  %v2294_v15 = vld [vmem:[#allocation5 + $0x280] ss:$16 sps:$4 sm:$0xff]   ;;  %v2763_v8 = vpack.c.bf16 %v73_v4, %v73_v4  ;;  %v2450_v4 = vld [vmem:[#allocation5 + $0x16c] ss:$16 sps:$4 sm:$0xff]  }
  0x3c   :  { %1334 = vmatprep.subr.bf16.mxu1 %v2285_v9  ;;  %v2295_v16 = vld [vmem:[#allocation5 + $0x64] ss:$16 sps:$4 sm:$0xff]   ;;  %v2299_v18 = vld [vmem:[#allocation5 + $0x60] ss:$16 sps:$4 sm:$0xff]   ;;  %v2765_v9 = vpack.c.bf16 %v75_v5, %v75_v5  ;;  %p2685_p10 = pnand %p2684_p9, %p2678_p6 }
  0x3d   :  { %v2297_v17 = vld [vmem:[#allocation5 + $0x264] ss:$16 sps:$4 sm:$0xff]   ;;  %v2300_v19 = vld [vmem:[#allocation5 + $0x260] ss:$16 sps:$4 sm:$0xff]  }
  0x3e   :  { %1294 = vmatpush1.bf16.msra.mxu0 %v2287_v10  ;;  %v2301_v20 = vld [vmem:[#allocation5 + $0x44] ss:$16 sps:$4 sm:$0xff]   ;;  %v2305_v22 = vld [vmem:[#allocation5 + $0x40] ss:$16 sps:$4 sm:$0xff]  }
  0x3f   :  { %1335 = vmatpush1.bf16.msra.mxu1 %v2288_v11  ;;  %1295 = vmatprep.subr.bf16.mxu0 %v2289_v12  ;;  %v2303_v21 = vld [vmem:[#allocation5 + $0x244] ss:$16 sps:$4 sm:$0xff]   ;;  %v2306_v23 = vld [vmem:[#allocation5 + $0x240] ss:$16 sps:$4 sm:$0xff]  }
  0x40   :  { %1336 = vmatprep.subr.bf16.mxu1 %v2291_v13  ;;  %v2307_v24 = vld [vmem:[#allocation5 + $0x24] ss:$16 sps:$4 sm:$0xff]   ;;  %v2311_v26 = vld [vmem:[#allocation5 + $0x20] ss:$16 sps:$4 sm:$0xff]   ;;  %v2378_v13 = vld [vmem:[#allocation5 + $0xec] ss:$16 sps:$4 sm:$0xff]  }
  0x41   :  { %v2309_v25 = vld [vmem:[#allocation5 + $0x224] ss:$16 sps:$4 sm:$0xff]   ;;  %v2312_v27 = vld [vmem:[#allocation5 + $0x220] ss:$16 sps:$4 sm:$0xff]  }
  0x42   :  { %1296 = vmatpush1.bf16.msra.mxu0 %v2293_v14  ;;  %v2313_v28 = vld [vmem:[#allocation5 + $0x4] ss:$16 sps:$4 sm:$0xff]   ;;  %v2317_v30 = vld [vmem:[#allocation5] ss:$16 sps:$4 sm:$0xff]  }
  0x43   :  { %1337 = vmatpush1.bf16.msra.mxu1 %v2294_v15  ;;  %1297 = vmatprep.subr.bf16.mxu0 %v2295_v16  ;;  %v2315_v29 = vld [vmem:[#allocation5 + $0x204] ss:$16 sps:$4 sm:$0xff]   ;;  %v2318_v31 = vld [vmem:[#allocation5 + $0x200] ss:$16 sps:$4 sm:$0xff]   ;;  %v79_v15 = vld [vmem:[#allocation2 + $0x30] sm:$0xff]  ;;  %v2713_v16 = vmov 0  }
  0x44   :  { %1338 = vmatprep.subr.bf16.mxu1 %v2297_v17  ;;  %v2319_v32 = vld [vmem:[#allocation5 + $0x1e4] ss:$16 sps:$4 sm:$0xff]   ;;  %v2323_v34 = vld [vmem:[#allocation5 + $0x1e0] ss:$16 sps:$4 sm:$0xff]  }
  0x45   :  { %v2321_v33 = vld [vmem:[#allocation5 + $0x3e4] ss:$16 sps:$4 sm:$0xff]   ;;  %v2324_v35 = vld [vmem:[#allocation5 + $0x3e0] ss:$16 sps:$4 sm:$0xff]  }
  0x46   :  { %1298 = vmatpush1.bf16.msra.mxu0 %v2299_v18  ;;  %v2325_v36 = vld [vmem:[#allocation5 + $0x1c4] ss:$16 sps:$4 sm:$0xff]   ;;  %v2329_v38 = vld [vmem:[#allocation5 + $0x1c0] ss:$16 sps:$4 sm:$0xff]   ;;  %v2376_v18 = vld [vmem:[#allocation5 + $0xe8] ss:$16 sps:$4 sm:$0xff]  }
  0x47   :  { %1339 = vmatpush1.bf16.msra.mxu1 %v2300_v19  ;;  %1299 = vmatprep.subr.bf16.mxu0 %v2301_v20  ;;  %v2327_v37 = vld [vmem:[#allocation5 + $0x3c4] ss:$16 sps:$4 sm:$0xff]   ;;  %v2330_v39 = vld [vmem:[#allocation5 + $0x3c0] ss:$16 sps:$4 sm:$0xff]   ;;  %v2770_v19 = vpack.c.bf16 %v79_v15, %v79_v15  ;;  %v77_v15 = vld [vmem:[#allocation2 + $0x20] sm:$0xff] }
  0x48   :  { %1340 = vmatprep.subr.bf16.mxu1 %v2303_v21  ;;  %v2331_v40 = vld [vmem:[#allocation5 + $0x1a4] ss:$16 sps:$4 sm:$0xff]   ;;  %v2335_v42 = vld [vmem:[#allocation5 + $0x1a0] ss:$16 sps:$4 sm:$0xff]   ;;  %v2384_v21 = vld [vmem:[#allocation5 + $0xcc] ss:$16 sps:$4 sm:$0xff]  }
  0x49   :  { %v2333_v41 = vld [vmem:[#allocation5 + $0x3a4] ss:$16 sps:$4 sm:$0xff]   ;;  %v2336_v43 = vld [vmem:[#allocation5 + $0x3a0] ss:$16 sps:$4 sm:$0xff]  }
  0x4a   :  { %1300 = vmatpush1.bf16.msra.mxu0 %v2305_v22  ;;  %v2337_v44 = vld [vmem:[#allocation5 + $0x184] ss:$16 sps:$4 sm:$0xff]   ;;  %v2341_v47 = vld [vmem:[#allocation5 + $0x180] ss:$16 sps:$4 sm:$0xff]  }
  0x4b   :  { %1341 = vmatpush1.bf16.msra.mxu1 %v2306_v23  ;;  %1301 = vmatprep.subr.bf16.mxu0 %v2307_v24  ;;  %v2339_v45 = vld [vmem:[#allocation5 + $0x384] ss:$16 sps:$4 sm:$0xff]   ;;  %v2342_v48 = vld [vmem:[#allocation5 + $0x380] ss:$16 sps:$4 sm:$0xff]   ;;  %v2382_v23 = vld [vmem:[#allocation5 + $0xc8] ss:$16 sps:$4 sm:$0xff]  }
  0x4c   :  { %1342 = vmatprep.subr.bf16.mxu1 %v2309_v25  ;;  %v74_v46 = vld [vmem:[#allocation2 + $0x8] sm:$0xff]  ;;  %v76_v50 = vld [vmem:[#allocation2 + $0x18] sm:$0xff]  ;;  %v2390_v25 = vld [vmem:[#allocation5 + $0xac] ss:$16 sps:$4 sm:$0xff]  }
  0x4d   :  { %v2757_v49 = vpack.c.bf16 %v74_v46, %v74_v46  ;;  %v2343_v51 = vld [vmem:[#allocation5 + $0x164] ss:$16 sps:$4 sm:$0xff]   ;;  %v2759_v52 = vpack.c.bf16 %v76_v50, %v76_v50  ;;  %v2347_v54 = vld [vmem:[#allocation5 + $0x160] ss:$16 sps:$4 sm:$0xff]  }
  0x4e   :  { %1302 = vmatpush1.bf16.msra.mxu0 %v2311_v26  ;;  %v2345_v53 = vld [vmem:[#allocation5 + $0x364] ss:$16 sps:$4 sm:$0xff]   ;;  %v2348_v55 = vld [vmem:[#allocation5 + $0x360] ss:$16 sps:$4 sm:$0xff]  }
  0x4f   :  { %1343 = vmatpush1.bf16.msra.mxu1 %v2312_v27  ;;  %1303 = vmatprep.subr.bf16.mxu0 %v2313_v28  ;;  %v2349_v56 = vld [vmem:[#allocation5 + $0x144] ss:$16 sps:$4 sm:$0xff]   ;;  %v2353_v58 = vld [vmem:[#allocation5 + $0x140] ss:$16 sps:$4 sm:$0xff]   ;;  %v2388_v27 = vld [vmem:[#allocation5 + $0xa8] ss:$16 sps:$4 sm:$0xff]  }
  0x50   :  { %1344 = vmatprep.subr.bf16.mxu1 %v2315_v29  ;;  %1321 = vmatprep.mubr.bf16.mxu0 %v2757_v49  ;;  %v2351_v57 = vld [vmem:[#allocation5 + $0x344] ss:$16 sps:$4 sm:$0xff]   ;;  %v2354_v59 = vld [vmem:[#allocation5 + $0x340] ss:$16 sps:$4 sm:$0xff]   ;;  %v2396_v29 = vld [vmem:[#allocation5 + $0x8c] ss:$16 sps:$4 sm:$0xff]  }
  0x51   :  { %1362 = vmatprep.mubr.bf16.mxu1 %v2759_v52  ;;  %v2355_v60 = vld [vmem:[#allocation5 + $0x124] ss:$16 sps:$4 sm:$0xff]   ;;  %v2359_v62 = vld [vmem:[#allocation5 + $0x120] ss:$16 sps:$4 sm:$0xff]  }
  0x52   :  { %1304 = vmatpush1.bf16.msra.mxu0 %v2317_v30  ;;  %v2357_v61 = vld [vmem:[#allocation5 + $0x324] ss:$16 sps:$4 sm:$0xff]   ;;  %v2360_v63 = vld [vmem:[#allocation5 + $0x320] ss:$16 sps:$4 sm:$0xff]  }
  0x53   :  { %1345 = vmatpush1.bf16.msra.mxu1 %v2318_v31  ;;  %1305 = vmatprep.subr.bf16.mxu0 %v2319_v32  ;;  %v2361_v0 = vld [vmem:[#allocation5 + $0x104] ss:$16 sps:$4 sm:$0xff]   ;;  %v2365_v2 = vld [vmem:[#allocation5 + $0x100] ss:$16 sps:$4 sm:$0xff]   ;;  %v2394_v31 = vld [vmem:[#allocation5 + $0x88] ss:$16 sps:$4 sm:$0xff]  }
  0x54   :  { %1346 = vmatprep.subr.bf16.mxu1 %v2321_v33  ;;  %v2363_v1 = vld [vmem:[#allocation5 + $0x304] ss:$16 sps:$4 sm:$0xff]   ;;  %v2366_v3 = vld [vmem:[#allocation5 + $0x300] ss:$16 sps:$4 sm:$0xff]   ;;  %v2402_v33 = vld [vmem:[#allocation5 + $0x6c] ss:$16 sps:$4 sm:$0xff]  }
  0x55   :  { %v2369_v6 = vld [vmem:[#allocation5 + $0x4e4] ss:$16 sps:$4 sm:$0xff]   ;;  %v2367_v10 = vld [vmem:[#allocation5 + $0x4e0] ss:$16 sps:$4 sm:$0xff]  }
  0x56   :  { %1306 = vmatpush2.bf16.msra.mxu0 %v2323_v34  ;;  %v2372_v7 = vld [vmem:[#allocation5 + $0x604] ss:$16 sps:$4 sm:$0xff]   ;;  %v2370_v11 = vld [vmem:[#allocation5 + $0x600] ss:$16 sps:$4 sm:$0xff]  }
  0x57   :  { %1347 = vmatpush2.bf16.msra.mxu1 %v2324_v35  ;;  %1307 = vmatprep.subr.bf16.mxu0 %v2325_v36  ;;  %v2375_v12 = vld [vmem:[#allocation5 + $0x4c4] ss:$16 sps:$4 sm:$0xff]   ;;  %v2373_v14 = vld [vmem:[#allocation5 + $0x4c0] ss:$16 sps:$4 sm:$0xff]  }
  0x58   :  { %1348 = vmatprep.subr.bf16.mxu1 %v2327_v37  ;;  %v2381_v17 = vld [vmem:[#allocation5 + $0x4a4] ss:$16 sps:$4 sm:$0xff]   ;;  %v2379_v20 = vld [vmem:[#allocation5 + $0x4a0] ss:$16 sps:$4 sm:$0xff]   ;;  %v2400_v37 = vld [vmem:[#allocation5 + $0x68] ss:$16 sps:$4 sm:$0xff]  }
  0x59   :  { %v2387_v22 = vld [vmem:[#allocation5 + $0x484] ss:$16 sps:$4 sm:$0xff]   ;;  %v2385_v24 = vld [vmem:[#allocation5 + $0x480] ss:$16 sps:$4 sm:$0xff]  }
  0x5a   :  { %1308 = vmatpush2.bf16.msra.mxu0 %v2329_v38  ;;  %v2393_v26 = vld [vmem:[#allocation5 + $0x464] ss:$16 sps:$4 sm:$0xff]   ;;  %v2391_v28 = vld [vmem:[#allocation5 + $0x460] ss:$16 sps:$4 sm:$0xff]  }
  0x5b   :  { %1349 = vmatpush2.bf16.msra.mxu1 %v2330_v39  ;;  %1309 = vmatprep.subr.bf16.mxu0 %v2331_v40  ;;  %v2399_v30 = vld [vmem:[#allocation5 + $0x444] ss:$16 sps:$4 sm:$0xff]   ;;  %v2397_v32 = vld [vmem:[#allocation5 + $0x440] ss:$16 sps:$4 sm:$0xff]   ;;  %v2408_v39 = vld [vmem:[#allocation5 + $0x4c] ss:$16 sps:$4 sm:$0xff]  }
  0x5c   :  { %1350 = vmatprep.subr.bf16.mxu1 %v2333_v41  ;;  %v2405_v34 = vld [vmem:[#allocation5 + $0x424] ss:$16 sps:$4 sm:$0xff]   ;;  %v2403_v38 = vld [vmem:[#allocation5 + $0x420] ss:$16 sps:$4 sm:$0xff]   ;;  %v2406_v41 = vld [vmem:[#allocation5 + $0x48] ss:$16 sps:$4 sm:$0xff]  }
  0x5d   :  { %v78_v35 = vld [vmem:[#allocation2 + $0x28] sm:$0xff] }
  0x5e   :  { %1310 = vmatpush2.bf16.msra.mxu0 %v2335_v42  ;;  %v2775_v36 = vpack.c.bf16 %v78_v35, %v78_v35  ;;  %v2411_v40 = vld [vmem:[#allocation5 + $0x404] ss:$16 sps:$4 sm:$0xff]   ;;  %v2409_v42 = vld [vmem:[#allocation5 + $0x400] ss:$16 sps:$4 sm:$0xff]   ;;  %v2489_v35 = vld [vmem:[#allocation5 + $0x26c] ss:$16 sps:$4 sm:$0xff]  }
  0x5f   :  { %1351 = vmatpush2.bf16.msra.mxu1 %v2336_v43  ;;  %1311 = vmatprep.subr.bf16.mxu0 %v2337_v44  ;;  %v2414_v43 = vld [vmem:[#allocation5 + $0x2c] ss:$16 sps:$4 sm:$0xff]   ;;  %v2417_v44 = vld [vmem:[#allocation5 + $0x5e4] ss:$16 sps:$4 sm:$0xff]   ;;  %v2415_v46 = vld [vmem:[#allocation5 + $0x5e0] ss:$16 sps:$4 sm:$0xff]  }
  0x60   :  { %1352 = vmatprep.subr.bf16.mxu1 %v2339_v45  ;;  %v2412_v45 = vld [vmem:[#allocation5 + $0x28] ss:$16 sps:$4 sm:$0xff]   ;;  %v2421_v50 = vld [vmem:[#allocation5 + $0x5c0] ss:$16 sps:$4 sm:$0xff]   ;;  %v2453_v5 = vld [vmem:[#allocation5 + $0x524] ss:$16 sps:$4 sm:$0xff]  }
  0x62   :  { %1312 = vmatpush2.bf16.msra.mxu0 %v2341_v47  ;;  %v2420_v47 = vld [vmem:[#allocation5 + $0xc] ss:$16 sps:$4 sm:$0xff]  }
  0x63   :  { %1353 = vmatpush2.bf16.msra.mxu1 %v2342_v48  ;;  %1313 = vmatprep.subr.bf16.mxu0 %v2343_v51  ;;  %v2423_v48 = vld [vmem:[#allocation5 + $0x5c4] ss:$16 sps:$4 sm:$0xff]   ;;  %v2426_v51 = vld [vmem:[#allocation5 + $0x1ec] ss:$16 sps:$4 sm:$0xff]  }
  0x64   :  { %1354 = vmatprep.subr.bf16.mxu1 %v2345_v53  ;;  %v2429_v53 = vld [vmem:[#allocation5 + $0x5a4] ss:$16 sps:$4 sm:$0xff]  }
  0x66   :  { %1314 = vmatpush2.bf16.msra.mxu0 %v2347_v54  ;;  %v2424_v54 = vld [vmem:[#allocation5 + $0x1e8] ss:$16 sps:$4 sm:$0xff]  }
  0x67   :  { %1355 = vmatpush2.bf16.msra.mxu1 %v2348_v55  ;;  %1315 = vmatprep.subr.bf16.mxu0 %v2349_v56  ;;  %v2427_v55 = vld [vmem:[#allocation5 + $0x5a0] ss:$16 sps:$4 sm:$0xff]   ;;  %v2432_v56 = vld [vmem:[#allocation5 + $0x1cc] ss:$16 sps:$4 sm:$0xff]  }
  0x68   :  { %1356 = vmatprep.subr.bf16.mxu1 %v2351_v57  ;;  %v2435_v57 = vld [vmem:[#allocation5 + $0x584] ss:$16 sps:$4 sm:$0xff]  }
  0x6a   :  { %1316 = vmatpush2.bf16.msra.mxu0 %v2353_v58  ;;  %v2430_v58 = vld [vmem:[#allocation5 + $0x1c8] ss:$16 sps:$4 sm:$0xff]  }
  0x6b   :  { %1357 = vmatpush2.bf16.msra.mxu1 %v2354_v59  ;;  %1317 = vmatprep.subr.bf16.mxu0 %v2355_v60  ;;  %v2433_v59 = vld [vmem:[#allocation5 + $0x580] ss:$16 sps:$4 sm:$0xff]   ;;  %v2438_v60 = vld [vmem:[#allocation5 + $0x1ac] ss:$16 sps:$4 sm:$0xff]  }
  0x6c   :  { %1358 = vmatprep.subr.bf16.mxu1 %v2357_v61  ;;  %v2441_v61 = vld [vmem:[#allocation5 + $0x564] ss:$16 sps:$4 sm:$0xff]  }
  0x6e   :  { %1318 = vmatpush2.bf16.msra.mxu0 %v2359_v62  ;;  %v2436_v62 = vld [vmem:[#allocation5 + $0x1a8] ss:$16 sps:$4 sm:$0xff]  }
  0x6f   :  { %1359 = vmatpush2.bf16.msra.mxu1 %v2360_v63  ;;  %1319 = vmatprep.subr.bf16.mxu0 %v2361_v0  ;;  %v2439_v63 = vld [vmem:[#allocation5 + $0x560] ss:$16 sps:$4 sm:$0xff]   ;;  %v2444_v0 = vld [vmem:[#allocation5 + $0x18c] ss:$16 sps:$4 sm:$0xff]  }
  0x70   :  { %1360 = vmatprep.subr.bf16.mxu1 %v2363_v1  ;;  %v2447_v1 = vld [vmem:[#allocation5 + $0x544] ss:$16 sps:$4 sm:$0xff]  }
  0x72   :  { %1320 = vmatpush2.bf16.msra.mxu0 %v2365_v2  ;;  %v2442_v2 = vld [vmem:[#allocation5 + $0x188] ss:$16 sps:$4 sm:$0xff]  }
  0x73   :  { %1361 = vmatpush2.bf16.msra.mxu1 %v2366_v3  ;;  %1371 = vmatprep.subr.bf16.mxu0 %v2369_v6  ;;  %v2445_v3 = vld [vmem:[#allocation5 + $0x540] ss:$16 sps:$4 sm:$0xff]   ;;  %v2448_v6 = vld [vmem:[#allocation5 + $0x168] ss:$16 sps:$4 sm:$0xff]  }
  0x74   :  { %1426 = vmatprep.subr.bf16.mxu1 %v2372_v7  ;;  %v2451_v7 = vld [vmem:[#allocation5 + $0x520] ss:$16 sps:$4 sm:$0xff]  }
  0x75   :  { %1322 = vmatmul.mubr.bf16.vlgmr.msra.gmra.mxu0 %v2763_v8 }
  0x76   :  { %1363 = vmatmul.mubr.bf16.vlgmr.msra.gmra.mxu1 %v2765_v9  ;;  %1372 = vmatpush1.bf16.msra.mxu0 %v2367_v10  ;;  %v2456_v10 = vld [vmem:[#allocation5 + $0x14c] ss:$16 sps:$4 sm:$0xff]  }
  0x77   :  { %1427 = vmatpush1.bf16.msra.mxu1 %v2370_v11  ;;  %1373 = vmatprep.subr.bf16.mxu0 %v2375_v12  ;;  %v2459_v11 = vld [vmem:[#allocation5 + $0x504] ss:$16 sps:$4 sm:$0xff]   ;;  %v2454_v12 = vld [vmem:[#allocation5 + $0x148] ss:$16 sps:$4 sm:$0xff]  }
  0x78   :  { %1444 = vmatprep.mubr.bf16.mxu1 %v2713_v16  ;;  %1453 = vmatprep.subr.bf16.mxu1 %v2378_v13  ;;  %v2457_v13 = vld [vmem:[#allocation5 + $0x500] ss:$16 sps:$4 sm:$0xff]  }
  0x79   :  { %1403 = vmatprep.mubr.bf16.mxu0 %v2775_v36 }
  0x7a   :  { %1374 = vmatpush1.bf16.msra.mxu0 %v2373_v14  ;;  %v2462_v14 = vld [vmem:[#allocation5 + $0x12c] ss:$16 sps:$4 sm:$0xff]  }
  0x7b   :  { %1375 = vmatprep.subr.bf16.mxu0 %v2381_v17  ;;  %v2465_v17 = vld [vmem:[#allocation5 + $0x2ec] ss:$16 sps:$4 sm:$0xff]  }
  0x7e   :  { %2182 = vmatmul.mubr.msk.bf16.vlgmr.msra.gmra.mxu1 %vm1285_vm0, %v2770_v19  ;;  %1376 = vmatpush1.bf16.msra.mxu0 %v2379_v20  ;;  %v2778_v20 = vpack.c.bf16 %v77_v15, %v77_v15  ;;  %v2552_v15 = vld [vmem:[#allocation5 + $0x54c] ss:$16 sps:$4 sm:$0xff]  }
  0x7f   :  { %1454 = vmatpush1.bf16.msra.mxu1 %v2376_v18  ;;  %1377 = vmatprep.subr.bf16.mxu0 %v2387_v22  ;;  %v2460_v18 = vld [vmem:[#allocation5 + $0x128] ss:$16 sps:$4 sm:$0xff]   ;;  %v2468_v22 = vld [vmem:[#allocation5 + $0x10c] ss:$16 sps:$4 sm:$0xff]  }
  0x80   :  { %1455 = vmatprep.subr.bf16.mxu1 %v2384_v21  ;;  %1485 = vmatprep.mubr.bf16.mxu1 %v2757_v49  ;;  %v2418_v49 = vld [vmem:[#allocation5 + $0x8] ss:$16 sps:$4 sm:$0xff]  }
  0x81   :  { %v2463_v21 = vld [vmem:[#allocation5 + $0x2e8] ss:$16 sps:$4 sm:$0xff]  }
  0x82   :  { %1378 = vmatpush1.bf16.msra.mxu0 %v2385_v24  ;;  %v2466_v24 = vld [vmem:[#allocation5 + $0x108] ss:$16 sps:$4 sm:$0xff]  }
  0x83   :  { %1456 = vmatpush1.bf16.msra.mxu1 %v2382_v23  ;;  %1379 = vmatprep.subr.bf16.mxu0 %v2393_v26  ;;  %v2471_v23 = vld [vmem:[#allocation5 + $0x2cc] ss:$16 sps:$4 sm:$0xff]  }
  0x84   :  { %1457 = vmatprep.subr.bf16.mxu1 %v2390_v25  ;;  %v2469_v25 = vld [vmem:[#allocation5 + $0x2c8] ss:$16 sps:$4 sm:$0xff]   ;;  %v2474_v26 = vld [vmem:[#allocation5 + $0x4ec] ss:$16 sps:$4 sm:$0xff]  }
  0x86   :  { %1380 = vmatpush1.bf16.msra.mxu0 %v2391_v28  ;;  %v2472_v28 = vld [vmem:[#allocation5 + $0x4e8] ss:$16 sps:$4 sm:$0xff]  }
  0x87   :  { %1458 = vmatpush1.bf16.msra.mxu1 %v2388_v27  ;;  %1381 = vmatprep.subr.bf16.mxu0 %v2399_v30  ;;  %v2477_v27 = vld [vmem:[#allocation5 + $0x2ac] ss:$16 sps:$4 sm:$0xff]  }
  0x88   :  { %1459 = vmatprep.subr.bf16.mxu1 %v2396_v29  ;;  %v2475_v29 = vld [vmem:[#allocation5 + $0x2a8] ss:$16 sps:$4 sm:$0xff]   ;;  %v2480_v30 = vld [vmem:[#allocation5 + $0x4cc] ss:$16 sps:$4 sm:$0xff]  }
  0x8a   :  { %1382 = vmatpush1.bf16.msra.mxu0 %v2397_v32  ;;  %v2478_v32 = vld [vmem:[#allocation5 + $0x4c8] ss:$16 sps:$4 sm:$0xff]  }
  0x8b   :  { %1460 = vmatpush1.bf16.msra.mxu1 %v2394_v31  ;;  %1383 = vmatprep.subr.bf16.mxu0 %v2405_v34  ;;  %v2483_v31 = vld [vmem:[#allocation5 + $0x28c] ss:$16 sps:$4 sm:$0xff]  }
  0x8c   :  { %1461 = vmatprep.subr.bf16.mxu1 %v2402_v33  ;;  %v2481_v33 = vld [vmem:[#allocation5 + $0x288] ss:$16 sps:$4 sm:$0xff]   ;;  %v2486_v34 = vld [vmem:[#allocation5 + $0x4ac] ss:$16 sps:$4 sm:$0xff]  }
  0x8e   :  { %1384 = vmatpush1.bf16.msra.mxu0 %v2403_v38  ;;  %v2487_v38 = vld [vmem:[#allocation5 + $0x268] ss:$16 sps:$4 sm:$0xff]  }
  0x8f   :  { %1462 = vmatpush1.bf16.msra.mxu1 %v2400_v37  ;;  %1385 = vmatprep.subr.bf16.mxu0 %v2411_v40  ;;  %v2484_v37 = vld [vmem:[#allocation5 + $0x4a8] ss:$16 sps:$4 sm:$0xff]  }
  0x90   :  { %1463 = vmatprep.subr.bf16.mxu1 %v2408_v39  ;;  %v2495_v39 = vld [vmem:[#allocation5 + $0x24c] ss:$16 sps:$4 sm:$0xff]   ;;  %v2490_v40 = vld [vmem:[#allocation5 + $0x488] ss:$16 sps:$4 sm:$0xff]  }
  0x92   :  { %1386 = vmatpush1.bf16.msra.mxu0 %v2409_v42  ;;  %v2498_v42 = vld [vmem:[#allocation5 + $0x46c] ss:$16 sps:$4 sm:$0xff]  }
  0x93   :  { %1464 = vmatpush1.bf16.msra.mxu1 %v2406_v41  ;;  %1387 = vmatprep.subr.bf16.mxu0 %v2417_v44  ;;  %v2493_v41 = vld [vmem:[#allocation5 + $0x248] ss:$16 sps:$4 sm:$0xff]  }
  0x94   :  { %1465 = vmatprep.subr.bf16.mxu1 %v2414_v43  ;;  %v2496_v43 = vld [vmem:[#allocation5 + $0x468] ss:$16 sps:$4 sm:$0xff]  }
  0x95   :  { %v2499_v44 = vld [vmem:[#allocation5 + $0x228] ss:$16 sps:$4 sm:$0xff]  }
  0x96   :  { %1388 = vmatpush2.bf16.msra.mxu0 %v2415_v46  ;;  %v2507_v46 = vld [vmem:[#allocation5 + $0x20c] ss:$16 sps:$4 sm:$0xff]  }
  0x97   :  { %1466 = vmatpush1.bf16.msra.mxu1 %v2412_v45  ;;  %1389 = vmatprep.subr.bf16.mxu0 %v2423_v48  ;;  %v2504_v45 = vld [vmem:[#allocation5 + $0x44c] ss:$16 sps:$4 sm:$0xff]  }
  0x98   :  { %1467 = vmatprep.subr.bf16.mxu1 %v2420_v47  ;;  %v2505_v47 = vld [vmem:[#allocation5 + $0x208] ss:$16 sps:$4 sm:$0xff]   ;;  %v2510_v48 = vld [vmem:[#allocation5 + $0x42c] ss:$16 sps:$4 sm:$0xff]  }
  0x9a   :  { %1390 = vmatpush2.bf16.msra.mxu0 %v2421_v50  ;;  %v2508_v50 = vld [vmem:[#allocation5 + $0x428] ss:$16 sps:$4 sm:$0xff]  }
  0x9b   :  { %1468 = vmatpush1.bf16.msra.mxu1 %v2418_v49  ;;  %1391 = vmatprep.subr.bf16.mxu0 %v2429_v53  ;;  %v2513_v49 = vld [vmem:[#allocation5 + $0x3ec] ss:$16 sps:$4 sm:$0xff]  }
  0x9c   :  { %1469 = vmatprep.subr.bf16.mxu1 %v2426_v51  ;;  %v2511_v51 = vld [vmem:[#allocation5 + $0x3e8] ss:$16 sps:$4 sm:$0xff]   ;;  %v2516_v53 = vld [vmem:[#allocation5 + $0x40c] ss:$16 sps:$4 sm:$0xff]  }
  0x9e   :  { %1392 = vmatpush2.bf16.msra.mxu0 %v2427_v55  ;;  %v2514_v55 = vld [vmem:[#allocation5 + $0x408] ss:$16 sps:$4 sm:$0xff]  }
  0x9f   :  { %1470 = vmatpush2.bf16.msra.mxu1 %v2424_v54  ;;  %1393 = vmatprep.subr.bf16.mxu0 %v2435_v57  ;;  %v2519_v54 = vld [vmem:[#allocation5 + $0x3cc] ss:$16 sps:$4 sm:$0xff]  }
  0xa0   :  { %1471 = vmatprep.subr.bf16.mxu1 %v2432_v56  ;;  %v2517_v56 = vld [vmem:[#allocation5 + $0x3c8] ss:$16 sps:$4 sm:$0xff]   ;;  %v2522_v57 = vld [vmem:[#allocation5 + $0x5ec] ss:$16 sps:$4 sm:$0xff]  }
  0xa2   :  { %1394 = vmatpush2.bf16.msra.mxu0 %v2433_v59  ;;  %v2520_v59 = vld [vmem:[#allocation5 + $0x5e8] ss:$16 sps:$4 sm:$0xff]  }
  0xa3   :  { %1472 = vmatpush2.bf16.msra.mxu1 %v2430_v58  ;;  %1395 = vmatprep.subr.bf16.mxu0 %v2441_v61  ;;  %v2525_v58 = vld [vmem:[#allocation5 + $0x3ac] ss:$16 sps:$4 sm:$0xff]  }
  0xa4   :  { %1473 = vmatprep.subr.bf16.mxu1 %v2438_v60  ;;  %v2523_v60 = vld [vmem:[#allocation5 + $0x3a8] ss:$16 sps:$4 sm:$0xff]   ;;  %v2528_v61 = vld [vmem:[#allocation5 + $0x5cc] ss:$16 sps:$4 sm:$0xff]  }
  0xa6   :  { %1396 = vmatpush2.bf16.msra.mxu0 %v2439_v63  ;;  %v2526_v63 = vld [vmem:[#allocation5 + $0x5c8] ss:$16 sps:$4 sm:$0xff]  }
  0xa7   :  { %1474 = vmatpush2.bf16.msra.mxu1 %v2436_v62  ;;  %1397 = vmatprep.subr.bf16.mxu0 %v2447_v1  ;;  %v2531_v62 = vld [vmem:[#allocation5 + $0x38c] ss:$16 sps:$4 sm:$0xff]  }
  0xa8   :  { %1475 = vmatprep.subr.bf16.mxu1 %v2444_v0  ;;  %v2529_v0 = vld [vmem:[#allocation5 + $0x388] ss:$16 sps:$4 sm:$0xff]   ;;  %v2534_v1 = vld [vmem:[#allocation5 + $0x5ac] ss:$16 sps:$4 sm:$0xff]  }
  0xaa   :  { %1398 = vmatpush2.bf16.msra.mxu0 %v2445_v3  ;;  %v2532_v3 = vld [vmem:[#allocation5 + $0x5a8] ss:$16 sps:$4 sm:$0xff]  }
  0xab   :  { %1476 = vmatpush2.bf16.msra.mxu1 %v2442_v2  ;;  %1399 = vmatprep.subr.bf16.mxu0 %v2453_v5  ;;  %v2537_v2 = vld [vmem:[#allocation5 + $0x36c] ss:$16 sps:$4 sm:$0xff]  }
  0xac   :  { %1477 = vmatprep.subr.bf16.mxu1 %v2450_v4  ;;  %v2535_v4 = vld [vmem:[#allocation5 + $0x368] ss:$16 sps:$4 sm:$0xff]   ;;  %v2540_v5 = vld [vmem:[#allocation5 + $0x58c] ss:$16 sps:$4 sm:$0xff]  }
  0xae   :  { %1400 = vmatpush2.bf16.msra.mxu0 %v2451_v7  ;;  %v2538_v7 = vld [vmem:[#allocation5 + $0x588] ss:$16 sps:$4 sm:$0xff]  }
  0xaf   :  { %1478 = vmatpush2.bf16.msra.mxu1 %v2448_v6  ;;  %1401 = vmatprep.subr.bf16.mxu0 %v2459_v11  ;;  %v2543_v6 = vld [vmem:[#allocation5 + $0x34c] ss:$16 sps:$4 sm:$0xff]  }
  0xb0   :  { %1479 = vmatprep.subr.bf16.mxu1 %v2456_v10  ;;  %v2541_v10 = vld [vmem:[#allocation5 + $0x348] ss:$16 sps:$4 sm:$0xff]   ;;  %v2546_v11 = vld [vmem:[#allocation5 + $0x56c] ss:$16 sps:$4 sm:$0xff]  }
  0xb2   :  { %1402 = vmatpush2.bf16.msra.mxu0 %v2457_v13  ;;  %v2544_v13 = vld [vmem:[#allocation5 + $0x568] ss:$16 sps:$4 sm:$0xff]  }
  0xb3   :  { %1480 = vmatpush2.bf16.msra.mxu1 %v2454_v12  ;;  %1494 = vmatprep.subr.bf16.mxu0 %v2465_v17  ;;  %v2549_v12 = vld [vmem:[#allocation5 + $0x32c] ss:$16 sps:$4 sm:$0xff]  }
  0xb4   :  { %1481 = vmatprep.subr.bf16.mxu1 %v2462_v14  ;;  %v2547_v14 = vld [vmem:[#allocation5 + $0x328] ss:$16 sps:$4 sm:$0xff]   ;;  %v2555_v17 = vld [vmem:[#allocation5 + $0x30c] ss:$16 sps:$4 sm:$0xff]  }
  0xb5   :  { %1404 = vmatmul.mubr.bf16.vlgmr.msra.gmra.mxu0 %v2778_v20 }
  0xb6   :  { %1495 = vmatpush1.bf16.msra.mxu0 %v2463_v21  ;;  %1526 = vmatprep.mubr.bf16.mxu0 %v2759_v52  ;;  %v2492_v52 = vld [vmem:[#allocation5 + $0x48c] ss:$16 sps:$4 sm:$0xff]   ;;  %v2553_v21 = vld [vmem:[#allocation5 + $0x308] ss:$16 sps:$4 sm:$0xff]  }
  0xb7   :  { %1482 = vmatpush2.bf16.msra.mxu1 %v2460_v18  ;;  %1496 = vmatprep.subr.bf16.mxu0 %v2471_v23  ;;  %v2550_v18 = vld [vmem:[#allocation5 + $0x548] ss:$16 sps:$4 sm:$0xff]   ;;  %v2561_v23 = vld [vmem:[#allocation5 + $0x60c] ss:$16 sps:$4 sm:$0xff]  }
  0xb8   :  { %1483 = vmatprep.subr.bf16.mxu1 %v2468_v22  ;;  %v2558_v22 = vld [vmem:[#allocation5 + $0x52c] ss:$16 sps:$4 sm:$0xff]  }
  0xba   :  { %1497 = vmatpush1.bf16.msra.mxu0 %v2469_v25  ;;  %v2559_v25 = vld [vmem:[#allocation5 + $0x608] ss:$16 sps:$4 sm:$0xff]  }
  0xbb   :  { %1484 = vmatpush2.bf16.msra.mxu1 %v2466_v24  ;;  %1498 = vmatprep.subr.bf16.mxu0 %v2477_v27  ;;  %v2556_v24 = vld [vmem:[#allocation5 + $0x528] ss:$16 sps:$4 sm:$0xff]   ;;  %v2565_v27 = vld [vmem:[#allocation8 + $0x78] sm:$0xff]  }
  0xbc   :  { %1535 = vmatprep.subr.bf16.mxu1 %v2474_v26  ;;  %v2564_v26 = vld [vmem:[#allocation5 + $0x50c] ss:$16 sps:$4 sm:$0xff]  }
  0xbe   :  { %1486 = vmatmul.mubr.bf16.vlgmr.msra.gmra.mxu1 %v2763_v8  ;;  %1499 = vmatpush1.bf16.msra.mxu0 %v2475_v29  ;;  %v2501_v8 = vld [vmem:[#allocation5 + $0x22c] ss:$16 sps:$4 sm:$0xff]  }
  0xbf   :  { %1536 = vmatpush1.bf16.msra.mxu1 %v2472_v28  ;;  %1500 = vmatprep.subr.bf16.mxu0 %v2483_v31  ;;  %v2562_v28 = vld [vmem:[#allocation5 + $0x508] ss:$16 sps:$4 sm:$0xff]   ;;  %v2566_v29 = vld [vmem:[#allocation8 + $0x38] sm:$0xff]  }
  0xc0   :  { %1537 = vmatprep.subr.bf16.mxu1 %v2480_v30  ;;  %1567 = vmatprep.mubr.bf16.mxu1 %v2775_v36  ;;  %v2502_v36 = vld [vmem:[#allocation5 + $0x448] ss:$16 sps:$4 sm:$0xff]  }
  0xc1   :  { %v2567_v30 = vld [vmem:[#allocation8 + $0x70] sm:$0xff]  }
  0xc2   :  { %1501 = vmatpush1.bf16.msra.mxu0 %v2481_v33  ;;  %v2568_v31 = vld [vmem:[#allocation8 + $0x30] sm:$0xff]   ;;  %v2571_v33 = vld [vmem:[#allocation8 + $0x60] sm:$0xff]  }
  0xc3   :  { %1538 = vmatpush1.bf16.msra.mxu1 %v2478_v32  ;;  %1502 = vmatprep.subr.bf16.mxu0 %v2489_v35  ;;  %v2569_v32 = vld [vmem:[#allocation8 + $0x68] sm:$0xff]   ;;  %v2582_v35 = vld [vmem:[#allocation8 + $0xb8] sm:$0xff]  }
  0xc4   :  { %1539 = vmatprep.subr.bf16.mxu1 %v2486_v34  ;;  %v2581_v34 = vld [vmem:[#allocation8 + $0xf8] sm:$0xff]  }
  0xc6   :  { %1503 = vmatpush1.bf16.msra.mxu0 %v2487_v38  ;;  %v2584_v38 = vld [vmem:[#allocation8 + $0xb0] sm:$0xff]  }
  0xc7   :  { %1540 = vmatpush1.bf16.msra.mxu1 %v2484_v37  ;;  %1504 = vmatprep.subr.bf16.mxu0 %v2495_v39  ;;  %v2572_v37 = vld [vmem:[#allocation8 + $0x20] sm:$0xff]   ;;  %v2586_v39 = vld [vmem:[#allocation8 + $0xa8] sm:$0xff]  }
  0xc8   :  { %1541 = vmatprep.subr.bf16.mxu1 %v2492_v52  ;;  %v2574_v52 = vld [vmem:[#allocation8 + $0x18] sm:$0xff]  }
  0xca   :  { %1505 = vmatpush1.bf16.msra.mxu0 %v2493_v41  ;;  %v2587_v41 = vld [vmem:[#allocation8 + $0xe0] sm:$0xff]  }
  0xcb   :  { %1542 = vmatpush1.bf16.msra.mxu1 %v2490_v40  ;;  %1506 = vmatprep.subr.bf16.mxu0 %v2501_v8  ;;  %v2575_v40 = vld [vmem:[#allocation8 + $0x50] sm:$0xff]   ;;  %v2577_v8 = vld [vmem:[#allocation8 + $0x48] sm:$0xff]  }
  0xcc   :  { %1543 = vmatprep.subr.bf16.mxu1 %v2498_v42  ;;  %v2576_v42 = vld [vmem:[#allocation8 + $0x10] sm:$0xff]  }
  0xce   :  { %1507 = vmatpush1.bf16.msra.mxu0 %v2499_v44  ;;  %v2579_v44 = vld [vmem:[#allocation8 + $0x40] sm:$0xff]  }
  0xcf   :  { %1544 = vmatpush1.bf16.msra.mxu1 %v2496_v43  ;;  %1508 = vmatprep.subr.bf16.mxu0 %v2507_v46  ;;  %v2578_v43 = vld [vmem:[#allocation8 + $0x8] sm:$0xff]   ;;  %v2588_v46 = vld [vmem:[#allocation8 + $0xa0] sm:$0xff]  }
  0xd0   :  { %1545 = vmatprep.subr.bf16.mxu1 %v2504_v45  ;;  %v2580_v45 = vld [vmem:[#allocation8] sm:$0xff]  }
  0xd2   :  { %1509 = vmatpush1.bf16.msra.mxu0 %v2505_v47 }
  0xd3   :  { %1546 = vmatpush1.bf16.msra.mxu1 %v2502_v36  ;;  %1510 = vmatprep.subr.bf16.mxu0 %v2513_v49 }
  0xd4   :  { %1547 = vmatprep.subr.bf16.mxu1 %v2510_v48 }
  0xd6   :  { %1511 = vmatpush2.bf16.msra.mxu0 %v2511_v51  ;;  %v2590_v51 = vld [vmem:[#allocation8 + $0x98] sm:$0xff]  }
  0xd7   :  { %1548 = vmatpush1.bf16.msra.mxu1 %v2508_v50  ;;  %1512 = vmatprep.subr.bf16.mxu0 %v2519_v54  ;;  %v2589_v50 = vld [vmem:[#allocation8 + $0xd8] sm:$0xff]  }
  0xd8   :  { %1549 = vmatprep.subr.bf16.mxu1 %v2516_v53 }
  0xda   :  { %1513 = vmatpush2.bf16.msra.mxu0 %v2517_v56 }
  0xdb   :  { %1550 = vmatpush1.bf16.msra.mxu1 %v2514_v55  ;;  %1514 = vmatprep.subr.bf16.mxu0 %v2525_v58  ;;  %v2592_v58 = vld [vmem:[#allocation8 + $0x90] sm:$0xff]  }
  0xdc   :  { %1551 = vmatprep.subr.bf16.mxu1 %v2522_v57  ;;  %v2591_v57 = vld [vmem:[#allocation8 + $0xd0] sm:$0xff]  }
  0xde   :  { %1515 = vmatpush2.bf16.msra.mxu0 %v2523_v60 }
  0xdf   :  { %1552 = vmatpush2.bf16.msra.mxu1 %v2520_v59  ;;  %1516 = vmatprep.subr.bf16.mxu0 %v2531_v62  ;;  %v2594_v62 = vld [vmem:[#allocation8 + $0x88] sm:$0xff]  }
  0xe0   :  { %1553 = vmatprep.subr.bf16.mxu1 %v2528_v61  ;;  %v2593_v61 = vld [vmem:[#allocation8 + $0xc8] sm:$0xff]  }
  0xe2   :  { %1517 = vmatpush2.bf16.msra.mxu0 %v2529_v0 }
  0xe3   :  { %1554 = vmatpush2.bf16.msra.mxu1 %v2526_v63  ;;  %1518 = vmatprep.subr.bf16.mxu0 %v2537_v2  ;;  %v2596_v2 = vld [vmem:[#allocation8 + $0x80] sm:$0xff]  }
  0xe4   :  { %1555 = vmatprep.subr.bf16.mxu1 %v2534_v1  ;;  %v2595_v1 = vld [vmem:[#allocation8 + $0xc0] sm:$0xff]  }
  0xe6   :  { %1519 = vmatpush2.bf16.msra.mxu0 %v2535_v4 }
  0xe7   :  { %1556 = vmatpush2.bf16.msra.mxu1 %v2532_v3  ;;  %1520 = vmatprep.subr.bf16.mxu0 %v2543_v6  ;;  %v285_v3 = vlaneseq  ;;  %v283_v6 = vld [vmem:[#allocation7] sm:$0xf] }
  0xe8   :  { %1557 = vmatprep.subr.bf16.mxu1 %v2540_v5 }
  0xe9   :  { %v286_v4 = vshrl.u32 %v285_v3, 7 }
  0xea   :  { %1521 = vmatpush2.bf16.msra.mxu0 %v2541_v10 }
  0xeb   :  { %1558 = vmatpush2.bf16.msra.mxu1 %v2538_v7  ;;  %1522 = vmatprep.subr.bf16.mxu0 %v2549_v12  ;;  %v287_v5 = vsub.s32 0, %v286_v4  ;;  %v291_v7 = vsub.s32 1, %v286_v4 }
  0xec   :  { %1559 = vmatprep.subr.bf16.mxu1 %v2546_v11 }
  0xed   :  { %v288_v10 = vrot.slane %v283_v6, %v287_v5  ;;  %v292_v11 = vrot.slane %v283_v6, %v291_v7 }
  0xee   :  { %1523 = vmatpush2.bf16.msra.mxu0 %v2547_v14 }
  0xef   :  { %1560 = vmatpush2.bf16.msra.mxu1 %v2544_v13  ;;  %1524 = vmatprep.subr.bf16.mxu0 %v2555_v17 }
  0xf0   :  { %1561 = vmatprep.subr.bf16.mxu1 %v2552_v15 }
  0xf2   :  { %1525 = vmatpush2.bf16.msra.mxu0 %v2553_v21 }
  0xf3   :  { %1562 = vmatpush2.bf16.msra.mxu1 %v2550_v18  ;;  %1590 = vmatprep.subr.bf16.mxu0 %v2561_v23 }
  0xf4   :  { %1563 = vmatprep.subr.bf16.mxu1 %v2558_v22 }
  0xf5   :  { %1527 = vmatmul.mubr.bf16.vlgmr.msra.gmra.mxu0 %v2765_v9  ;;  %v2570_v9 = vld [vmem:[#allocation8 + $0x28] sm:$0xff]  }
  0xf6   :  { %1591 = vmatpush1.bf16.msra.mxu0 %v2559_v25  ;;  %1608 = vmatprep.mubr.bf16.mxu0 %v2713_v16  ;;  %v2583_v16 = vld [vmem:[#allocation8 + $0xf0] sm:$0xff]  }
  0xf7   :  { %1564 = vmatpush2.bf16.msra.mxu1 %v2556_v24  ;;  %2217 = vmatprep.subr.bf16.mxu0 %v2565_v27 }
  0xf8   :  { %1565 = vmatprep.subr.bf16.mxu1 %v2564_v26 }
  0xfb   :  { %1566 = vmatpush2.bf16.msra.mxu1 %v2562_v28 }
  0xfc   :  { %2239 = vmatprep.subr.bf16.mxu1 %v2581_v34  ;;  %v295_v34 = vsub.s32 2, %v286_v4 }
  0xfd   :  { %2183 = vmatmul.mubr.msk.bf16.vlgmr.msra.gmra.mxu0 %vm1285_vm0, %v2770_v19  ;;  %v2585_v19 = vld [vmem:[#allocation8 + $0xe8] sm:$0xff]  }
  0xfe   :  { %1568 = vmatmul.mubr.bf16.vlgmr.msra.gmra.mxu1 %v2778_v20  ;;  %2218 = vmatpush3.bf16.msra.mxu0 %v2566_v29  ;;  %v2573_v20 = vld [vmem:[#allocation8 + $0x58] sm:$0xff]  }
  0xff   :  { %2219 = vmatprep.subr.bf16.mxu0 %v2567_v30  ;;  %2240 = vmatpush3.bf16.msra.mxu1 %v2582_v35  ;;  %v299_v35 = vsub.s32 3, %v286_v4 }
 0x100   :  { %2241 = vmatprep.subr.bf16.mxu1 %v2583_v16 }
 0x102   :  { %2220 = vmatpush3.bf16.msra.mxu0 %v2568_v31 }
 0x103   :  { %2221 = vmatprep.subr.bf16.mxu0 %v2569_v32  ;;  %2242 = vmatpush3.bf16.msra.mxu1 %v2584_v38 }
 0x104   :  { %2243 = vmatprep.subr.bf16.mxu1 %v2585_v19 }
 0x106   :  { %2222 = vmatpush3.bf16.msra.mxu0 %v2570_v9 }
 0x107   :  { %2223 = vmatprep.subr.bf16.mxu0 %v2571_v33  ;;  %2244 = vmatpush3.bf16.msra.mxu1 %v2586_v39 }
 0x108   :  { %2245 = vmatprep.subr.bf16.mxu1 %v2587_v41 }
 0x10a   :  { %2224 = vmatpush3.bf16.msra.mxu0 %v2572_v37  ;;  %v296_v37 = vrot.slane %v283_v6, %v295_v34 }
 0x10b   :  { %2225 = vmatprep.subr.bf16.mxu0 %v2573_v20  ;;  %2246 = vmatpush3.bf16.msra.mxu1 %v2588_v46  ;;  %v300_v20 = vrot.slane %v283_v6, %v299_v35 }
 0x10c   :  { %2247 = vmatprep.subr.bf16.mxu1 %v2589_v50 }
 0x10e   :  { %2226 = vmatpush3.bf16.msra.mxu0 %v2574_v52 }
 0x10f   :  { %2227 = vmatprep.subr.bf16.mxu0 %v2575_v40  ;;  %2248 = vmatpush3.bf16.msra.mxu1 %v2590_v51 }
 0x110   :  { %2249 = vmatprep.subr.bf16.mxu1 %v2591_v57 }
 0x112   :  { %2228 = vmatpush3.bf16.msra.mxu0 %v2576_v42 }
 0x113   :  { %2229 = vmatprep.subr.bf16.mxu0 %v2577_v8  ;;  %2250 = vmatpush3.bf16.msra.mxu1 %v2592_v58 }
 0x114   :  { %2251 = vmatprep.subr.bf16.mxu1 %v2593_v61 }
 0x116   :  { %2230 = vmatpush3.bf16.msra.mxu0 %v2578_v43 }
 0x117   :  { %2231 = vmatprep.subr.bf16.mxu0 %v2579_v44  ;;  %2252 = vmatpush3.bf16.msra.mxu1 %v2594_v62 }
 0x118   :  { %2253 = vmatprep.subr.bf16.mxu1 %v2595_v1 }
 0x11a   :  { %2232 = vmatpush3.bf16.msra.mxu0 %v2580_v45 }
 0x11b   :  { %2254 = vmatpush3.bf16.msra.mxu1 %v2596_v2 }
 0x135   :  { %v1323_v36 = vpop.f32.mrf.mxu0 }
 0x136   :  { %v1364_v47 = vpop.f32.mrf.mxu1  ;;  %v1324_v12 = vadd.f32 %v1323_v36, %v288_v10 }
 0x137   :  { %v1325_v48 = vpop.f32.mrf.mxu0 }
 0x138   :  { %v1366_v49 = vpop.f32.mrf.mxu1  ;;  %v1326_v13 = vadd.f32 %v1325_v48, %v292_v11  ;;  %v1365_v14 = vadd.f32 %v1364_v47, %v1324_v12 }
 0x139   :  { %v1327_v53 = vpop.f32.mrf.mxu0 }
 0x13a   :  { %v1368_v54 = vpop.f32.mrf.mxu1  ;;  %v1367_v17 = vadd.f32 %v1366_v49, %v1326_v13 }
 0x13b   :  { %v1328_v55 = vpop.f32.mrf.mxu0 }
 0x13c   :  { %v1369_v56 = vpop.f32.mrf.mxu1 }
 0x13e   :  { %v1446_v59 = vpop.f32.mrf.mxu1 }
 0x140   :  { %v1448_v60 = vpop.f32.mrf.mxu1 }
 0x142   :  { %v1450_v63 = vpop.f32.mrf.mxu1 }
 0x143   :  { %v2184_v63 = vld [vmem:[%s2799_s4] ss:$0 sm:$0xff] }
 0x144   :  { %v1451_v0 = vpop.f32.mrf.mxu1 }
 0x175   :  { %v1405_v15 = vpop.f32.mrf.mxu0 }
 0x176   :  { %v1406_v18 = vadd.f32 %v1405_v15, %v1365_v14 }
 0x177   :  { %v1407_v21 = vpop.f32.mrf.mxu0 }
 0x178   :  { %v1447_v22 = vadd.f32 %v1446_v59, %v1406_v18  ;;  %v1408_v23 = vadd.f32 %v1407_v21, %v1367_v17 }
 0x179   :  { %v1409_v24 = vpop.f32.mrf.mxu0 }
 0x17a   :  { %v1449_v25 = vadd.f32 %v1448_v60, %v1408_v23  ;;  %v1617_v26 = vmax.f32 %v1447_v22, 0.0 }
 0x17b   :  { %v1410_v27 = vpop.f32.mrf.mxu0 }
 0x17c   :  { %v1618_v28 = vmax.f32 %v1449_v25, 0.0  ;;  %v1621_v31 = vpack.c.bf16 %v1617_v26, %v1617_v26 }
 0x17e   :  { %v1487_v29 = vpop.f32.mrf.mxu1  ;;  %v1622_v30 = vpack.c.bf16 %v1618_v28, %v1618_v28 }
 0x17f   :  { %v1488_v52 = vadd.f32 %v1487_v29, %v296_v37 }
 0x180   :  { %v1489_v32 = vpop.f32.mrf.mxu1  ;;  %1920 = vmatprep.mubr.bf16.mxu0 %v1622_v30 }
 0x181   :  { %1921 = vmatmul.mubr.bf16.vlgmr.msra.gmra.mxu0 %v1621_v31  ;;  %v1490_v40 = vadd.f32 %v1489_v32, %v300_v20 }
 0x182   :  { %v1491_v9 = vpop.f32.mrf.mxu1 }
 0x184   :  { %v1492_v33 = vpop.f32.mrf.mxu1 }
 0x1b5   :  { %v1528_v16 = vpop.f32.mrf.mxu0 }
 0x1b6   :  { %v1529_v41 = vadd.f32 %v1528_v16, %v1488_v52 }
 0x1b7   :  { %v1530_v38 = vpop.f32.mrf.mxu0 }
 0x1b8   :  { %v1531_v43 = vadd.f32 %v1530_v38, %v1490_v40 }
 0x1b9   :  { %v1532_v19 = vpop.f32.mrf.mxu0 }
 0x1bb   :  { %v1533_v39 = vpop.f32.mrf.mxu0 }
 0x1bd   :  { %v1610_v8 = vpop.f32.mrf.mxu0 }
 0x1be   :  { %v1569_v42 = vpop.f32.mrf.mxu1 }
 0x1bf   :  { %v1570_v44 = vadd.f32 %v1569_v42, %v1529_v41  ;;  %v1612_v46 = vpop.f32.mrf.mxu0 }
 0x1c0   :  { %v1571_v45 = vpop.f32.mrf.mxu1 }
 0x1c1   :  { %v1611_v36 = vadd.f32 %v1610_v8, %v1570_v44  ;;  %v1572_v47 = vadd.f32 %v1571_v45, %v1531_v43  ;;  %v1614_v49 = vpop.f32.mrf.mxu0 }
 0x1c2   :  { %v1573_v48 = vpop.f32.mrf.mxu1 }
 0x1c3   :  { %v1613_v50 = vadd.f32 %v1612_v46, %v1572_v47  ;;  %v1619_v51 = vmax.f32 %v1611_v36, 0.0  ;;  %v1615_v54 = vpop.f32.mrf.mxu0 }
 0x1c4   :  { %v1574_v53 = vpop.f32.mrf.mxu1 }
 0x1c5   :  { %v1620_v55 = vmax.f32 %v1613_v50, 0.0  ;;  %v1623_v57 = vpack.c.bf16 %v1619_v51, %v1619_v51 }
 0x1c7   :  { %v1624_v56 = vpack.c.bf16 %v1620_v55, %v1620_v55 }
 0x1c9   :  { %1960 = vmatprep.mubr.bf16.mxu1 %v1624_v56 }
 0x1ca   :  { %1961 = vmatmul.mubr.bf16.vlgmr.msra.gmra.mxu1 %v1623_v57 }
 0x241   :  { %v2233_v58 = vpop.f32.mrf.mxu0 }
 0x243   :  { %v2234_v59 = vpop.f32.mrf.mxu0 }
 0x244   :  { %v2235_v60 = vadd.f32 %v2234_v59, %v2233_v58 }
 0x245   :  { %v2236_v61 = vpop.f32.mrf.mxu0 }
 0x246   :  { %v1923_v2 = vadd.f32 %v2235_v60, %v2184_v63 }
 0x247   :  { %v2237_v62 = vpop.f32.mrf.mxu0 }
 0x28a   :  { %v2255_v0 = vpop.f32.mrf.mxu1 }
 0x28c   :  { %v2256_v1 = vpop.f32.mrf.mxu1 }
 0x28d   :  { %v2257_v3 = vadd.f32 %v2256_v1, %v2255_v0 }
 0x28e   :  { %v2258_v4 = vpop.f32.mrf.mxu1 }
 0x28f   :  { %v1963_v5 = vadd.f32 %v2257_v3, %v1923_v2 }
 0x290   :  { %v2259_v6 = vpop.f32.mrf.mxu1 }
 0x291   :  { %1968 = vst [vmem:[#allocation10] sm:$0xff] %v1963_v5 }
 0x292   :  { %2688 = shalt.err (!%p2685_p10)
}
 0x293   :  { %1978 = dma.vmem_to_hbm [thread:$0]  %s1976_s16, 128, %s2800_s5, [#allocation4]  }
 0x294   :  { %2703 = dma.done.wait [#allocation4], 128  }
 0x295   :  { %2704 = vsyncadd [#allocation4], 4294967168 }
 0x296   :  { %1982 = vsyncpa [#allocation3], 1 }
 0x297   :  { %1983 = vsyncpa [#allocation6], 1 }
 0x298   :  { %1984 = vsyncpa [#allocation9], 1 }
 0x299   :  { %1985 = vsyncpa [#allocation4], 1 }

</bundles_post_ra>
